<compile_context>
chip_gen: v5e
topology: v5e:2x2
jax: 0.10.0
libtpu: 0.0.40
codegen_flags: <defaults>
</compile_context>

<pallas_src>
import jax
import jax.numpy as jnp
from jax.experimental import pallas as pl
from jax.experimental.pallas import tpu as pltpu


def mlp_kernel(x_ref, w1_ref, b1_ref, w2_ref, b2_ref, w3_ref, b3_ref, o_ref):
    # x tile: (TB, 9) bf16; weights bf16; biases f32; all accumulation in f32 on the MXU.
    x = x_ref[...]
    h1 = jnp.dot(x, w1_ref[...], preferred_element_type=jnp.float32) + b1_ref[...]
    h1 = jnp.maximum(h1, 0.0)
    h2 = jnp.dot(h1.astype(jnp.bfloat16), w2_ref[...],
                 preferred_element_type=jnp.float32) + b2_ref[...]
    h2 = jnp.maximum(h2, 0.0)
    out = jnp.dot(h2.astype(jnp.bfloat16), w3_ref[...],
                  preferred_element_type=jnp.float32) + b3_ref[...]
    # Lane-dense (TB, 128) store; padded columns are exactly zero and sliced off outside.
    o_ref[...] = out.astype(o_ref.dtype)


def nn3_forward(x, params, *, tb=1024):
    """x: (B, 9) f32.  params: (w1,b1,w2,b2,w3,b3) with W stored as (in, out)."""
    w1, b1, w2, b2, w3, b3 = params
    B, f_in = x.shape
    H = 128                      # hidden width == lane-dense output width
    out_dim = w3.shape[1]        # 9

    # --- Lane-dense last layer: zero-pad w3 -> (128, 128), b3 -> (1, 128). ---
    w3p = jnp.zeros((w3.shape[0], H), w3.dtype).at[:, :out_dim].set(w3)
    b3p = jnp.zeros((1, H), b3.dtype).at[:, :out_dim].set(b3)

    # --- bf16 MXU operands (f32 accumulation happens inside the kernel). ---
    x_bf = x.astype(jnp.bfloat16)
    w1_bf = w1.astype(jnp.bfloat16)
    w2_bf = w2.astype(jnp.bfloat16)
    w3_bf = w3p.astype(jnp.bfloat16)

    # --- Batch tiling: TB rows per grid step (multiple of 8 sublanes, capped at `tb`). ---
    tb = min(tb, max(8, -(-B // 8) * 8))
    tb = -(-tb // 8) * 8
    b_pad = -(-B // tb) * tb
    if b_pad != B:
        x_bf = jnp.pad(x_bf, ((0, b_pad - B), (0, 0)))
    grid = (b_pad // tb,)

    row_spec = lambda shape: pl.BlockSpec(shape, lambda i: (i, 0))   # tiled over batch
    res_spec = lambda shape: pl.BlockSpec(shape, lambda i: (0, 0))   # resident across grid

    # Advisory cost estimate so XLA can schedule neighbours around the custom call.
    flops = 2 * b_pad * (f_in * H + H * H + H * H)
    bytes_accessed = (x_bf.size * 2
                      + (w1_bf.size + w2_bf.size + w3_bf.size) * 2
                      + (b1.size + b2.size + b3p.size) * 4
                      + b_pad * H * 4)

    out = pl.pallas_call(
        mlp_kernel,
        out_shape=jax.ShapeDtypeStruct((b_pad, H), jnp.float32),
        grid=grid,
        in_specs=[
            row_spec((tb, f_in)),
            res_spec(w1_bf.shape),
            res_spec(b1.shape),
            res_spec(w2_bf.shape),
            res_spec(b2.shape),
            res_spec(w3_bf.shape),
            res_spec(b3p.shape),
        ],
        out_specs=row_spec((tb, H)),
        compiler_params=pltpu.CompilerParams(
            dimension_semantics=("parallel",),          # shard batch steps across TCs (v7x)
            vmem_limit_bytes=32 * 1024 * 1024,          # TB=1024 tile fits easily on all gens
        ),
        cost_estimate=pl.CostEstimate(
            flops=flops, transcendentals=0, bytes_accessed=bytes_accessed),
    )(x_bf, w1_bf, b1, w2_bf, b2, w3_bf, b3p)

    return out[:B, :out_dim]


def init_params(key):
    # Mirrors nn.Linear shapes: l1: 9->128, l2: 128->128, l3: 128->9 (stored as (in, out)).
    k1, k2, k3, k4, k5, k6 = jax.random.split(key, 6)

    def linear_init(kw, kb, fan_in, fan_out):
        bound = 1.0 / jnp.sqrt(fan_in)
        w = jax.random.uniform(kw, (fan_in, fan_out), jnp.float32, -bound, bound)
        b = jax.random.uniform(kb, (1, fan_out), jnp.float32, -bound, bound)
        return w, b

    w1, b1 = linear_init(k1, k2, 9, 128)
    w2, b2 = linear_init(k3, k4, 128, 128)
    w3, b3 = linear_init(k5, k6, 128, 9)
    return w1, b1, w2, b2, w3, b3


if __name__ == "__main__":
    key = jax.random.PRNGKey(0)
    kx, kp = jax.random.split(key)

    B = 8  # small demo batch (kernel tiles larger batches automatically)
    x = jax.random.normal(kx, (B, 9), jnp.float32)
    params = init_params(kp)

    out = jax.block_until_ready(nn3_forward(x, params))
    assert out.shape == (B, 9)

    # Reference using the same bf16-input / f32-accumulate math as the kernel.
    w1, b1, w2, b2, w3, b3 = params
    xb = x.astype(jnp.bfloat16)
    h = jnp.maximum(jnp.dot(xb, w1.astype(jnp.bfloat16),
                            preferred_element_type=jnp.float32) + b1, 0.0)
    h = jnp.maximum(jnp.dot(h.astype(jnp.bfloat16), w2.astype(jnp.bfloat16),
                            preferred_element_type=jnp.float32) + b2, 0.0)
    ref = jnp.dot(h.astype(jnp.bfloat16), w3.astype(jnp.bfloat16),
                  preferred_element_type=jnp.float32) + b3
    assert jnp.allclose(out, ref, atol=1e-3, rtol=1e-3)

    # Sanity: close to the pure-f32 PyTorch-equivalent forward (bf16 input rounding only).
    ref32 = jnp.maximum(x @ w1 + b1, 0.0)
    ref32 = jnp.maximum(ref32 @ w2 + b2, 0.0)
    ref32 = ref32 @ w3 + b3
    assert jnp.allclose(out, ref32, atol=5e-2, rtol=5e-2)

    print("KERNEL_OK")
</pallas_src>

<mosaic_0001>
module attributes {stable_mosaic.version = 11 : i64} {
  func.func @mlp_kernel(%arg0: i32, %arg1: memref<8x9xbf16, #tpu.memory_space<vmem>>, %arg2: memref<9x128xbf16, #tpu.memory_space<vmem>>, %arg3: memref<1x128xf32, #tpu.memory_space<vmem>>, %arg4: memref<128x128xbf16, #tpu.memory_space<vmem>>, %arg5: memref<1x128xf32, #tpu.memory_space<vmem>>, %arg6: memref<128x128xbf16, #tpu.memory_space<vmem>>, %arg7: memref<1x128xf32, #tpu.memory_space<vmem>>, %arg8: memref<8x128xf32, #tpu.memory_space<vmem>>) attributes {dimension_semantics = [#tpu.dimension_semantics<parallel>], iteration_bounds = array<i64: 1>, scalar_prefetch = 0 : i64, scratch_operands = 0 : i64, tpu.core_type = #tpu.core_type<tc>, window_params = [{transform_indices = @transform_0, window_bounds = array<i64: 8, 9>}, {pipeline_mode = #tpu.pipeline_mode<synchronous>, transform_indices = @transform_1, window_bounds = array<i64: 9, 128>}, {pipeline_mode = #tpu.pipeline_mode<synchronous>, transform_indices = @transform_2, window_bounds = array<i64: 1, 128>}, {pipeline_mode = #tpu.pipeline_mode<synchronous>, transform_indices = @transform_3, window_bounds = array<i64: 128, 128>}, {pipeline_mode = #tpu.pipeline_mode<synchronous>, transform_indices = @transform_4, window_bounds = array<i64: 1, 128>}, {pipeline_mode = #tpu.pipeline_mode<synchronous>, transform_indices = @transform_5, window_bounds = array<i64: 128, 128>}, {pipeline_mode = #tpu.pipeline_mode<synchronous>, transform_indices = @transform_6, window_bounds = array<i64: 1, 128>}, {transform_indices = @transform_7, window_bounds = array<i64: 8, 128>}]} {
    %c0 = arith.constant 0 : index
    %c0_0 = arith.constant 0 : index
    %0 = vector.load %arg1[%c0, %c0_0] : memref<8x9xbf16, #tpu.memory_space<vmem>>, vector<8x9xbf16>
    %c0_1 = arith.constant 0 : index
    %c0_2 = arith.constant 0 : index
    %1 = vector.load %arg2[%c0_1, %c0_2] : memref<9x128xbf16, #tpu.memory_space<vmem>>, vector<9x128xbf16>
    %cst = arith.constant dense<0.000000e+00> : vector<8x128xf32>
    %2 = tpu.matmul %0, %1, %cst {dimension_numbers = #tpu.dot_dimension_numbers<[1], [0], [0], [1], [0, 0, 1, 1], [], []>} : vector<8x9xbf16>, vector<9x128xbf16>, vector<8x128xf32> -> vector<8x128xf32>
    %c0_3 = arith.constant 0 : index
    %c0_4 = arith.constant 0 : index
    %3 = vector.load %arg3[%c0_3, %c0_4] : memref<1x128xf32, #tpu.memory_space<vmem>>, vector<1x128xf32>
    %4 = vector.broadcast %3 : vector<1x128xf32> to vector<8x128xf32>
    %5 = arith.addf %2, %4 : vector<8x128xf32>
    %cst_5 = arith.constant 0.000000e+00 : f32
    %6 = vector.broadcast %cst_5 : f32 to vector<8x128xf32>
    %7 = arith.maximumf %5, %6 : vector<8x128xf32>
    %8 = arith.truncf %7 : vector<8x128xf32> to vector<8x128xbf16>
    %c0_6 = arith.constant 0 : index
    %c0_7 = arith.constant 0 : index
    %9 = vector.load %arg4[%c0_6, %c0_7] : memref<128x128xbf16, #tpu.memory_space<vmem>>, vector<128x128xbf16>
    %cst_8 = arith.constant dense<0.000000e+00> : vector<8x128xf32>
    %10 = tpu.matmul %8, %9, %cst_8 {dimension_numbers = #tpu.dot_dimension_numbers<[1], [0], [0], [1], [0, 0, 1, 1], [], []>} : vector<8x128xbf16>, vector<128x128xbf16>, vector<8x128xf32> -> vector<8x128xf32>
    %c0_9 = arith.constant 0 : index
    %c0_10 = arith.constant 0 : index
    %11 = vector.load %arg5[%c0_9, %c0_10] : memref<1x128xf32, #tpu.memory_space<vmem>>, vector<1x128xf32>
    %12 = vector.broadcast %11 : vector<1x128xf32> to vector<8x128xf32>
    %13 = arith.addf %10, %12 : vector<8x128xf32>
    %cst_11 = arith.constant 0.000000e+00 : f32
    %14 = vector.broadcast %cst_11 : f32 to vector<8x128xf32>
    %15 = arith.maximumf %13, %14 : vector<8x128xf32>
    %16 = arith.truncf %15 : vector<8x128xf32> to vector<8x128xbf16>
    %c0_12 = arith.constant 0 : index
    %c0_13 = arith.constant 0 : index
    %17 = vector.load %arg6[%c0_12, %c0_13] : memref<128x128xbf16, #tpu.memory_space<vmem>>, vector<128x128xbf16>
    %cst_14 = arith.constant dense<0.000000e+00> : vector<8x128xf32>
    %18 = tpu.matmul %16, %17, %cst_14 {dimension_numbers = #tpu.dot_dimension_numbers<[1], [0], [0], [1], [0, 0, 1, 1], [], []>} : vector<8x128xbf16>, vector<128x128xbf16>, vector<8x128xf32> -> vector<8x128xf32>
    %c0_15 = arith.constant 0 : index
    %c0_16 = arith.constant 0 : index
    %19 = vector.load %arg7[%c0_15, %c0_16] : memref<1x128xf32, #tpu.memory_space<vmem>>, vector<1x128xf32>
    %20 = vector.broadcast %19 : vector<1x128xf32> to vector<8x128xf32>
    %21 = arith.addf %18, %20 : vector<8x128xf32>
    %c0_17 = arith.constant 0 : index
    %c0_18 = arith.constant 0 : index
    %22 = vector.load %arg8[%c0_17, %c0_18] : memref<8x128xf32, #tpu.memory_space<vmem>>, vector<8x128xf32>
    tpu.vector_store %arg8[%c0_17, %c0_18], %21 {strides = array<i32>} : memref<8x128xf32, #tpu.memory_space<vmem>>, vector<8x128xf32>,
    return
  }
  func.func @transform_0(%arg0: i32) -> (i32, i32) {
    %c0_i32 = arith.constant 0 : i32
    %c0_i32_0 = arith.constant 0 : i32
    return %arg0, %c0_i32 : i32, i32
  }
  func.func @transform_1(%arg0: i32) -> (i32, i32) {
    %c0_i32 = arith.constant 0 : i32
    %c0_i32_0 = arith.constant 0 : i32
    %c0_i32_1 = arith.constant 0 : i32
    return %c0_i32, %c0_i32_0 : i32, i32
  }
  func.func @transform_2(%arg0: i32) -> (i32, i32) {
    %c0_i32 = arith.constant 0 : i32
    %c0_i32_0 = arith.constant 0 : i32
    %c0_i32_1 = arith.constant 0 : i32
    return %c0_i32, %c0_i32_0 : i32, i32
  }
  func.func @transform_3(%arg0: i32) -> (i32, i32) {
    %c0_i32 = arith.constant 0 : i32
    %c0_i32_0 = arith.constant 0 : i32
    %c0_i32_1 = arith.constant 0 : i32
    return %c0_i32, %c0_i32_0 : i32, i32
  }
  func.func @transform_4(%arg0: i32) -> (i32, i32) {
    %c0_i32 = arith.constant 0 : i32
    %c0_i32_0 = arith.constant 0 : i32
    %c0_i32_1 = arith.constant 0 : i32
    return %c0_i32, %c0_i32_0 : i32, i32
  }
  func.func @transform_5(%arg0: i32) -> (i32, i32) {
    %c0_i32 = arith.constant 0 : i32
    %c0_i32_0 = arith.constant 0 : i32
    %c0_i32_1 = arith.constant 0 : i32
    return %c0_i32, %c0_i32_0 : i32, i32
  }
  func.func @transform_6(%arg0: i32) -> (i32, i32) {
    %c0_i32 = arith.constant 0 : i32
    %c0_i32_0 = arith.constant 0 : i32
    %c0_i32_1 = arith.constant 0 : i32
    return %c0_i32, %c0_i32_0 : i32, i32
  }
  func.func @transform_7(%arg0: i32) -> (i32, i32) {
    %c0_i32 = arith.constant 0 : i32
    %c0_i32_0 = arith.constant 0 : i32
    return %arg0, %c0_i32 : i32, i32
  }
}

</mosaic_0001>

<bundles_post_ra>
// kernel: tpu_custom_call.1
= control target key start
LH: loop header
LB: loop body
LE: loop exit
PB: predicated region body
PF: predicated region fallthrough
CT: control target
= control target key end

     0   :  { %12 = vsyncpa [#allocation3], 0  ;;  %s608_s0 = inlined_call_operand.hbm [shape: bf16[8,9], index: 0, kind: input, shape index: {}]   ;;  %s609_s1 = inlined_call_operand.hbm [shape: bf16[9,128], index: 1, kind: input, shape index: {}]   ;;  %s610_s2 = inlined_call_operand.vmem [shape: f32[1,128], index: 2, kind: input, shape index: {}]   ;;  %s611_s3 = inlined_call_operand.hbm [shape: bf16[128,128], index: 3, kind: input, shape index: {}]   ;;  %s612_s4 = inlined_call_operand.vmem [shape: f32[1,128], index: 4, kind: input, shape index: {}]   ;;  %s613_s5 = inlined_call_operand.hbm [shape: bf16[128,128], index: 5, kind: input, shape index: {}]   ;;  %s614_s6 = inlined_call_operand.vmem [shape: f32[1,128], index: 6, kind: input, shape index: {}]   ;;  %s615_s7 = inlined_call_operand.hbm [shape: f32[8,128], index: 7, kind: output, shape index: {}]  }
   0x1   :  { %13 = vsyncpa [#allocation6], 0 }
   0x2   :  { %14 = vsyncpa [#allocation9], 0  ;;  %s31_s26 = sshll.u32 %s609_s1, 4  ;;  %s32_s26 = int_to_ptr.hbm [resolvable:$true] %s31_s26 }
   0x3   :  { %15 = vsyncpa [#allocation4], 0  ;;  %s536_s27 = smov [#allocation5]   ;;  %s21_s8 = sshll.u32 %s608_s0, 4  ;;  %s22_s8 = int_to_ptr.hbm [resolvable:$true] %s21_s8 }
   0x4   :  { %s33_s28 = sshll.u32 %s536_s27, 4  ;;  %s537_s9 = smov 64   ;;  %s34_s28 = int_to_ptr.vmem [resolvable:$true] %s33_s28 }
   0x5   :  { %s538_s10 = smov 4   ;;  %s539_s11 = smov [#allocation2]  }
   0x6   :  { %39 = dma.hbm_to_vmem [thread:$0]  %s32_s26, 128, %s34_s28, [#allocation6], %s537_s9, %s537_s9, %s538_s10  }
   0x7   :  { %s23_s12 = sshll.u32 %s539_s11, 4  ;;  %s46_s15 = sshll.u32 %s611_s3, 4  ;;  %s24_s12 = int_to_ptr.vmem [resolvable:$true] %s23_s12  ;;  %s47_s15 = int_to_ptr.hbm [resolvable:$true] %s46_s15 }
   0x8   :  { %26 = dma.hbm_to_vmem [thread:$0]  %s22_s8, 64, %s24_s12, [#allocation3]  }
   0x9   :  { %s61_s17 = sshll.u32 %s613_s5, 4  ;;  %s540_s18 = smov [#allocation7]   ;;  %s62_s17 = int_to_ptr.hbm [resolvable:$true] %s61_s17 }
   0xa   :  { %s48_s19 = sshll.u32 %s540_s18, 4  ;;  %s541_s0 = smov [#allocation8]   ;;  %s49_s19 = int_to_ptr.vmem [resolvable:$true] %s48_s19 }
   0xb   :  { %54 = dma.hbm_to_vmem [thread:$0]  %s47_s15, 1024, %s49_s19, [#allocation6], %s537_s9, %s537_s9, %s538_s10  }
   0xc   :  { %s63_s20 = sshll.u32 %s541_s0, 4  ;;  %s64_s20 = int_to_ptr.vmem [resolvable:$true] %s63_s20 }
   0xd   :  { %69 = dma.hbm_to_vmem [thread:$0]  %s62_s17, 1024, %s64_s20, [#allocation9], %s537_s9, %s537_s9, %s538_s10  }
   0xe   :  { %528 = dma.done.wait [#allocation3], 64  }
   0xf   :  { %529 = vsyncadd [#allocation3], 4294967232 }
  0x10   :  { %530 = dma.done.wait [#allocation6], 1152  }
  0x11   :  { %531 = vsyncadd [#allocation6], 4294966144 }
  0x12   :  { %532 = dma.done.wait [#allocation9], 1024  }
  0x13   :  { %533 = vsyncadd [#allocation9], 4294966272  ;;  %vm105_vm0 = vcmask 1043456   ;;  %vm106_vm1 = vcmask 1044480   ;;  %v542_v0 = vmov 65535   ;;  %v388_v6 = vld [vmem:[#allocation7 + $0x38] sm:$0xff] }
  0x14   :  { %v107_v1 = vsel %vm105_vm0, 4294967295, %v542_v0  ;;  %v313_v2 = vld [vmem:[#allocation5] sm:$0xf]  ;;  %v380_v3 = vld [vmem:[#allocation5] sm:$0x10]  ;;  %195 = vmatpush.bf16.msra.mxu1 %v388_v6  ;;  %v387_v8 = vld [vmem:[#allocation7 + $0x30] sm:$0xff] }
  0x15   :  { %v108_v4 = vsel %vm106_vm1, %v107_v1, 0  ;;  %v314_v5 = vor.u32 %v380_v3, %v313_v2  ;;  %v89_v9 = vld [vmem:[#allocation2] sm:$0xf]  ;;  %vm101_vm2 = vcmask 72704   ;;  %v386_v10 = vld [vmem:[#allocation7 + $0x28] sm:$0xff]  ;;  %v385_v11 = vld [vmem:[#allocation7 + $0x20] sm:$0xff] }
  0x16   :  { %v384_v12 = vld [vmem:[#allocation7 + $0x18] sm:$0xff]  ;;  %v383_v13 = vld [vmem:[#allocation7 + $0x10] sm:$0xff]  ;;  %v382_v14 = vld [vmem:[#allocation7 + $0x8] sm:$0xff]  ;;  %s543_s24 = smov [#allocation10]   ;;  %s299_s28 = sshll.u32 %s615_s7, 4  ;;  %s300_s28 = int_to_ptr.hbm [resolvable:$true] %s299_s28 }
  0x17   :  { %v110_v7 = vand.u32 %v314_v5, %v108_v4  ;;  %v381_v15 = vld [vmem:[#allocation7] sm:$0xff]  ;;  %v396_v16 = vld [vmem:[#allocation8 + $0x38] sm:$0xff]  ;;  %v395_v17 = vld [vmem:[#allocation8 + $0x30] sm:$0xff]  ;;  %s297_s25 = sshll.u32 %s543_s24, 4  ;;  %s298_s25 = int_to_ptr.vmem [resolvable:$true] %s297_s25 }
  0x18   :  { %196 = vmatpush.bf16.msra.mxu1 %v387_v8  ;;  %278 = vmatpush.bf16.msra.mxu2 %v396_v16  ;;  %v394_v18 = vld [vmem:[#allocation8 + $0x28] sm:$0xff]  ;;  %v393_v19 = vld [vmem:[#allocation8 + $0x20] sm:$0xff]  ;;  %v392_v20 = vld [vmem:[#allocation8 + $0x18] sm:$0xff] }
  0x19   :  { %119 = vmatpush.bf16.msra.mxu0 %v110_v7  ;;  %v391_v21 = vld [vmem:[#allocation8 + $0x10] sm:$0xff]  ;;  %v390_v28 = vld [vmem:[#allocation8 + $0x8] sm:$0xff]  ;;  %v389_v29 = vld [vmem:[#allocation8] sm:$0xff] }
  0x1a   :  { %v405_v22 = vld [vmem:[%s610_s2] ss:$0 sm:$0xff] }
  0x1b   :  { %v406_v30 = vld [vmem:[%s612_s4] ss:$0 sm:$0xff] }
  0x1c   :  { %315 = vmatmul.msk.bf16.vlgmr.msra.gmra.mxu0 %vm101_vm2, %v89_v9  ;;  %197 = vmatpush.bf16.msra.mxu1 %v386_v10  ;;  %v407_v36 = vld [vmem:[%s614_s6] ss:$0 sm:$0xff] }
  0x1d   :  { %279 = vmatpush.bf16.msra.mxu2 %v395_v17 }
  0x20   :  { %198 = vmatpush.bf16.msra.mxu1 %v385_v11 }
  0x21   :  { %280 = vmatpush.bf16.msra.mxu2 %v394_v18 }
  0x24   :  { %199 = vmatpush.bf16.msra.mxu1 %v384_v12 }
  0x25   :  { %281 = vmatpush.bf16.msra.mxu2 %v393_v19 }
  0x28   :  { %200 = vmatpush.bf16.msra.mxu1 %v383_v13 }
  0x29   :  { %282 = vmatpush.bf16.msra.mxu2 %v392_v20 }
  0x2c   :  { %201 = vmatpush.bf16.msra.mxu1 %v382_v14 }
  0x2d   :  { %283 = vmatpush.bf16.msra.mxu2 %v391_v21 }
  0x30   :  { %202 = vmatpush.bf16.msra.mxu1 %v381_v15 }
  0x31   :  { %284 = vmatpush.bf16.msra.mxu2 %v390_v28 }
  0x35   :  { %285 = vmatpush.bf16.msra.mxu2 %v389_v29 }
  0x99   :  { %v121_v23 = vpop.f32.mrf.mxu0 }
  0x9a   :  { %v122_v24 = vadd.f32 %v405_v22, %v121_v23 }
  0x9c   :  { %v125_v25 = vmax.f32 %v122_v24, 0.0 }
  0x9e   :  { %v126_v26 = vpack.c.bf16 %v125_v25, %v125_v25 }
  0xa0   :  { %203 = vmatmul.bf16.vlgmr.msra.gmra.mxu1 %v126_v26 }
  0xa1   :  { %v123_v27 = vpop.f32.mrf.mxu0 }
 0x11d   :  { %v204_v31 = vpop.f32.mrf.mxu1 }
 0x11e   :  { %v205_v32 = vadd.f32 %v406_v30, %v204_v31 }
 0x120   :  { %v208_v33 = vmax.f32 %v205_v32, 0.0 }
 0x122   :  { %v209_v34 = vpack.c.bf16 %v208_v33, %v208_v33 }
 0x124   :  { %286 = vmatmul.bf16.vlgmr.msra.gmra.mxu2 %v209_v34 }
 0x125   :  { %v206_v35 = vpop.f32.mrf.mxu1 }
 0x1a7   :  { %v287_v37 = vpop.f32.mrf.mxu2 }
 0x1a8   :  { %v288_v38 = vadd.f32 %v407_v36, %v287_v37 }
 0x1aa   :  { %291 = vst [vmem:[#allocation10] sm:$0xff] %v288_v38 }
 0x1ab   :  { %302 = dma.vmem_to_hbm [thread:$0]  %s298_s25, 128, %s300_s28, [#allocation4]  }
 0x1af   :  { %v289_v39 = vpop.f32.mrf.mxu2 }
 0x1b0   :  { %534 = dma.done.wait [#allocation4], 128  }
 0x1b1   :  { %535 = vsyncadd [#allocation4], 4294967168 }
 0x1b2   :  { %307 = vsyncpa [#allocation3], 1 }
 0x1b3   :  { %308 = vsyncpa [#allocation6], 1 }
 0x1b4   :  { %309 = vsyncpa [#allocation9], 1 }
 0x1b5   :  { %310 = vsyncpa [#allocation4], 1 }

</bundles_post_ra>
